<compile_context>
chip_gen: v7x
topology: tpu7x:2x2x1
jax: 0.10.0
libtpu: 0.0.40
codegen_flags: <defaults>
</compile_context>

<pallas_src>
import math
import functools

import jax
import jax.numpy as jnp
from jax import lax
from jax.experimental import pallas as pl
from jax.experimental.pallas import tpu as pltpu


_NEG_BIG = -1e30   # finite "minus infinity" (no NaN-able rows)


# ------------------------------- sizing helpers ------------------------------


def _vmem_limit_bytes():
    """Per-generation scoped-VMEM limit (~half of physical per-core VMEM)."""
    cap = None
    try:
        cap = getattr(pltpu.get_tpu_info(), "vmem_capacity_bytes", None)
    except Exception:
        cap = None
    if not cap:
        cap = 64 * 1024 * 1024          # conservative: v7x per-core VMEM
    return int(min(cap // 2, 96 * 1024 * 1024))


def _choose_lk_chunk(l_k):
    for c in (1024, 512, 256):
        if l_k > c and l_k % c == 0:
            return c
    return l_k


def _choose_q_tile(l_q, l_k, d, vmem_limit):
    chunk = min(l_k, _choose_lk_chunk(l_k))

    def fits(tq):
        est = (2 * tq * d * 2           # q bf16, double-buffered
               + 2 * l_k * d * 2        # k bf16, double-buffered
               + 2 * tq * l_k * 2       # cnt bf16 (worst case double-buffered)
               + 2 * tq * 4             # M output
               + 2 * tq * chunk * 4     # live qk + masked temp (one chunk)
               + tq * d * 4)            # cnt@K accumulator
        return est <= vmem_limit * 0.9

    for tq in (1024, 512, 256, 128):
        if l_q % tq == 0 and fits(tq):
            return tq
    for tq in (64, 32, 16, 8):
        if l_q % tq == 0:
            return tq
    return l_q


def _choose_group(h, l_k, u_pad, d, vmem_limit, output_attention):
    """Number of (b, h) pairs handled per kernel-2 grid step (must divide H)."""
    for g in (8, 4, 2):
        if h % g != 0:
            continue
        est = (2 * g * u_pad * d * 2        # q_top bf16, dbuf
               + 2 * 2 * g * l_k * d * 2    # k + v bf16, dbuf
               + 2 * g * u_pad * 4          # idx, dbuf
               + 2 * g * u_pad * d * 4      # context out f32, dbuf
               + 2 * g * u_pad * l_k * 4)   # live scores + exp
        if output_attention:
            est += 2 * g * u_pad * l_k * 2  # bf16 attn out, dbuf
        if est <= vmem_limit * 0.8:
            return g
    return 1


# ----------------------------- Pallas kernels ------------------------------


def _sparsity_kernel(q_ref, k_ref, cnt_ref, m_ref, *, inv_l_k, chunk_lk,
                     n_chunks):
    """Prob-sparse measure for a tile of queries.

    q_ref:   (tq, D)    bf16 query tile
    k_ref:   (L_K, D)   bf16 keys of this (b, h)
    cnt_ref: (tq, L_K)  bf16 multiplicity of each key in the per-row sample
    m_ref:   (tq, 1)    f32 output: max(sampled qk) - sum(sampled qk)/L_K
    The QK tile lives only in VMEM/vregs (per L_K-chunk) — never hits HBM.
    The sampled sum is computed on the MXU: sum_k cnt*qk == sum_d q*(cnt@K).
    """
    q = q_ref[...]                                             # (tq, D)
    if n_chunks == 1:
        k_all = k_ref[...]
        cnt_all = cnt_ref[...]
        qk = lax.dot_general(q, k_all, (((1,), (1,)), ((), ())),
                             preferred_element_type=jnp.float32)
        m_max = jnp.max(jnp.where(cnt_all > 0, qk, _NEG_BIG),
                        axis=-1, keepdims=True)
        ck = lax.dot_general(cnt_all, k_all, (((1,), (0,)), ((), ())),
                             preferred_element_type=jnp.float32)
    else:
        def body(c, carry):
            m_run, ck_run = carry
            start = pl.multiple_of(c * chunk_lk, chunk_lk)
            k_c = k_ref[pl.ds(start, chunk_lk), :]             # (chunk, D)
            cnt_c = cnt_ref[:, pl.ds(start, chunk_lk)]         # (tq, chunk)
            qk = lax.dot_general(q, k_c, (((1,), (1,)), ((), ())),
                                 preferred_element_type=jnp.float32)
            m_run = jnp.maximum(
                m_run,
                jnp.max(jnp.where(cnt_c > 0, qk, _NEG_BIG),
                        axis=-1, keepdims=True))
            ck_run = ck_run + lax.dot_general(
                cnt_c, k_c, (((1,), (0,)), ((), ())),
                preferred_element_type=jnp.float32)
            return m_run, ck_run

        m0 = jnp.full((q.shape[0], 1), _NEG_BIG, jnp.float32)
        ck0 = jnp.zeros((q.shape[0], q.shape[1]), jnp.float32)
        m_max, ck = lax.fori_loop(0, n_chunks, body, (m0, ck0),
                                  unroll=(n_chunks <= 8))

    sampled_sum = jnp.sum(q.astype(jnp.float32) * ck, axis=-1, keepdims=True)
    m_ref[...] = m_max - sampled_sum * inv_l_k


def _attn_kernel(tau_ref, delta_ref, q_ref, k_ref, v_ref, idx_ref, ctx_ref,
                 *attn_ref, group, use_mask, exact_recip):
    """scores = Q_top@K^T * (tau*scale) + (delta*scale); ProbMask; softmax; @V.

    Handles `group` (b, h) pairs per grid step via batched einsums.
    tau_ref/delta_ref are SMEM (BH,) scalar-prefetch arrays (scale pre-folded,
    constant within the group because group | H).
    """
    bh0 = pl.program_id(0) * group
    tau = tau_ref[bh0]
    delta = delta_ref[bh0]
    qk = jnp.einsum('gud,gkd->guk', q_ref[...], k_ref[...],
                    preferred_element_type=jnp.float32)        # (G, u_pad, L_K)
    s = qk * tau + delta
    if use_mask:
        col = lax.broadcasted_iota(jnp.int32, s.shape, 2)
        s = jnp.where(col > idx_ref[...], _NEG_BIG, s)         # ProbMask
    m = jnp.max(s, axis=-1, keepdims=True)
    p = jnp.exp(s - m)                                         # unnormalized
    denom = jnp.sum(p, axis=-1, keepdims=True)
    if exact_recip:
        inv = 1.0 / denom
    else:
        inv = pl.reciprocal(denom, approx=True)                # EUP slot
    ctx = jnp.einsum('guk,gkd->gud', p.astype(v_ref.dtype), v_ref[...],
                     preferred_element_type=jnp.float32)       # (G, u_pad, D)
    ctx_ref[...] = (ctx * inv).astype(ctx_ref.dtype)
    if attn_ref:  # only materialized when output_attention=True (bf16)
        attn_ref[0][...] = (p * inv).astype(attn_ref[0].dtype)


# --------------------------- pallas_call wrappers ---------------------------


def _sparsity_measure(q, k, cnt, *, vmem_limit):
    """M measure per query row, (BH, L_Q) f32, without writing QK to HBM."""
    BH, L_Q, D = q.shape
    L_K = k.shape[1]
    tq = _choose_q_tile(L_Q, L_K, D, vmem_limit)
    n_qt = L_Q // tq
    chunk = _choose_lk_chunk(L_K)
    n_chunks = (L_K // chunk) if chunk < L_K else 1
    kernel = functools.partial(_sparsity_kernel, inv_l_k=1.0 / L_K,
                               chunk_lk=chunk, n_chunks=n_chunks)
    itemsize = q.dtype.itemsize
    cost = pl.CostEstimate(
        flops=int(4 * BH * L_Q * L_K * D + 4 * BH * L_Q * L_K),
        transcendentals=0,
        bytes_accessed=int(BH * L_Q * D * itemsize
                           + n_qt * BH * L_K * D * itemsize
                           + L_Q * L_K * cnt.dtype.itemsize
                           + BH * L_Q * 4))
    cnt_map = lambda i, b: (i, 0)

    def run(cnt_spec):
        return pl.pallas_call(
            kernel,
            out_shape=jax.ShapeDtypeStruct((BH, L_Q, 1), jnp.float32),
            # b*h is the fastest grid axis => the cnt block (which only depends
            # on the q-tile index) stays resident across the whole BH sweep.
            grid=(n_qt, BH),
            in_specs=[
                pl.BlockSpec((None, tq, D), lambda i, b: (b, i, 0)),
                pl.BlockSpec((None, L_K, D), lambda i, b: (b, 0, 0)),
                cnt_spec,
            ],
            out_specs=pl.BlockSpec((None, tq, 1), lambda i, b: (b, i, 0)),
            compiler_params=pltpu.CompilerParams(
                dimension_semantics=("parallel", "parallel"),
                vmem_limit_bytes=vmem_limit),
            cost_estimate=cost,
        )(q, k, cnt)

    # TODO(synk): M output stays (BH, L_Q, 1) (narrow store); a lane-dense
    # (BH, L_Q) layout would need an in-kernel (tq,1)->(1,tq) transpose.
    # cnt's block index only changes once per full BH sweep: single-buffer it
    # to free a tq x L_K VMEM buffer (matters on v7x's 64 MiB VMEM).
    if hasattr(pl, "Buffered"):
        try:
            m = run(pl.BlockSpec((tq, L_K), cnt_map,
                                 pipeline_mode=pl.Buffered(1)))
            return m[..., 0]
        except Exception:
            pass
    return run(pl.BlockSpec((tq, L_K), cnt_map))[..., 0]


def _update_rows(q_top, k, v, idx, tau_s, delta_s, *, use_mask,
                 output_attention, heads, vmem_limit):
    """Fused rescale + ProbMask + softmax + attn@V for the top-u query rows."""
    BH, u_pad, D = q_top.shape
    L_K = k.shape[1]
    G = _choose_group(heads, L_K, u_pad, D, vmem_limit, output_attention)
    kernel = functools.partial(_attn_kernel, group=G, use_mask=use_mask,
                               exact_recip=output_attention)
    ctx_spec = pl.BlockSpec((G, u_pad, D), lambda g, *_: (g, 0, 0))
    if output_attention:
        out_shape = (jax.ShapeDtypeStruct((BH, u_pad, D), jnp.float32),
                     jax.ShapeDtypeStruct((BH, u_pad, L_K), jnp.bfloat16))
        out_specs = (ctx_spec,
                     pl.BlockSpec((G, u_pad, L_K), lambda g, *_: (g, 0, 0)))
    else:
        out_shape = jax.ShapeDtypeStruct((BH, u_pad, D), jnp.float32)
        out_specs = ctx_spec
    itemsize = q_top.dtype.itemsize
    bytes_out = BH * u_pad * D * 4 + (BH * u_pad * L_K * 2
                                      if output_attention else 0)
    cost = pl.CostEstimate(
        flops=int(4 * BH * u_pad * L_K * D + 8 * BH * u_pad * L_K),
        transcendentals=int(BH * u_pad * L_K),
        bytes_accessed=int(BH * (u_pad * D + 2 * L_K * D) * itemsize
                           + BH * u_pad * 4 + BH * 8 + bytes_out))
    grid_spec = pltpu.PrefetchScalarGridSpec(
        num_scalar_prefetch=2,                 # tau*scale, delta*scale in SMEM
        grid=(BH // G,),
        in_specs=[
            pl.BlockSpec((G, u_pad, D), lambda g, *_: (g, 0, 0)),
            pl.BlockSpec((G, L_K, D), lambda g, *_: (g, 0, 0)),
            pl.BlockSpec((G, L_K, D), lambda g, *_: (g, 0, 0)),
            pl.BlockSpec((G, u_pad, 1), lambda g, *_: (g, 0, 0)),
        ],
        out_specs=out_specs,
    )
    res = pl.pallas_call(
        kernel,
        out_shape=out_shape,
        grid_spec=grid_spec,
        compiler_params=pltpu.CompilerParams(
            dimension_semantics=("parallel",),
            vmem_limit_bytes=vmem_limit),
        cost_estimate=cost,
    )(tau_s, delta_s, q_top, k, v, idx)
    if output_attention:
        return res
    return res, None


# ------------------------------ forward pass -------------------------------


def ds_prob_attention(queries, keys, values, attn_mask=None, tau=None,
                      delta=None, *, mask_flag=True, factor=5, scale=None,
                      output_attention=False, sample_key=None,
                      compute_dtype=jnp.bfloat16):
    """Forward pass of DSProbAttention.

    queries/keys/values: (B, L, H, D).  Returns ((B, H, L_Q, D), attn_or_None).
    """
    del attn_mask  # the reference module ignores it (ProbMask is built inside)
    B, L_Q, H, D = queries.shape
    L_K = keys.shape[1]
    BH = B * H
    out_dtype = values.dtype
    vmem_limit = _vmem_limit_bytes()

    # (B, L, H, D) -> (B*H, L, D); bf16 for the MXU, f32 accumulation in-kernel.
    q = jnp.transpose(queries, (0, 2, 1, 3)).reshape(BH, L_Q, D)
    k = jnp.transpose(keys, (0, 2, 1, 3)).reshape(BH, L_K, D)
    v = jnp.transpose(values, (0, 2, 1, 3)).reshape(BH, L_K, D)
    q_c = q.astype(compute_dtype)
    k_c = k.astype(compute_dtype)
    v_c = v.astype(compute_dtype)
    v_f32 = v.astype(jnp.float32)

    U_part = min(factor * int(math.ceil(math.log(L_K))), L_K)
    u = min(factor * int(math.ceil(math.log(L_Q))), L_Q)

    # --- _prob_QK part 1: sampled sparsity measure M (fused QK reduction) ---
    if sample_key is None:
        sample_key = jax.random.PRNGKey(0)
    index_sample = jax.random.randint(sample_key, (L_Q, U_part), 0, L_K)
    # multiplicity of each key column in every query row's random sample;
    # counts are small integers -> exact in bf16 and MXU-friendly.
    # TODO(synk): the scatter-add / top_k / gather / scatter / cumsum glue
    # stays in XLA; it only touches O(B*H*L*D) bytes.
    cnt = (jnp.zeros((L_Q, L_K), jnp.float32)
           .at[jnp.arange(L_Q)[:, None], index_sample].add(1.0)
           .astype(compute_dtype))
    M = _sparsity_measure(q_c, k_c, cnt, vmem_limit=vmem_limit)   # (BH, L_Q)

    # --- top-u query selection ---------------------------------------------
    _, m_top = lax.top_k(M, u)                                    # (BH, u)
    u_pad = max(16, ((u + 15) // 16) * 16)        # bf16 sublane packing (x16)
    m_top_pad = (m_top if u_pad == u
                 else jnp.pad(m_top, ((0, 0), (0, u_pad - u))))
    q_top = jnp.take_along_axis(q_c, m_top_pad[..., None], axis=1)
    idx = m_top_pad[..., None].astype(jnp.int32)                  # (BH,u_pad,1)

    # --- de-stationary factors: scale pre-folded, passed as SMEM scalars ----
    scale_v = float(scale) if scale else 1.0 / math.sqrt(D)
    tau_b = (jnp.ones((B,), jnp.float32) if tau is None
             else jnp.asarray(tau, jnp.float32).reshape(B))
    delta_b = (jnp.zeros((B,), jnp.float32) if delta is None
               else jnp.asarray(delta, jnp.float32).reshape(B))
    tau_s = jnp.broadcast_to(tau_b[:, None] * scale_v, (B, H)).reshape(BH)
    delta_s = jnp.broadcast_to(delta_b[:, None] * scale_v, (B, H)).reshape(BH)

    # --- initial context -----------------------------------------------------
    if mask_flag:
        assert L_Q == L_K, "mask_flag=True requires self-attention (L_Q == L_V)"
        context = jnp.cumsum(v_f32, axis=1)                       # (BH,L_Q,D)
    else:
        context = jnp.broadcast_to(jnp.mean(v_f32, axis=1, keepdims=True),
                                   (BH, L_Q, D))

    # --- rescale + ProbMask + softmax + attn @ V (fused Pallas kernel) -------
    ctx_u, attn_u = _update_rows(q_top, k_c, v_c, idx, tau_s, delta_s,
                                 use_mask=mask_flag,
                                 output_attention=output_attention,
                                 heads=H, vmem_limit=vmem_limit)

    bh_idx = jnp.arange(BH)[:, None]
    context = context.at[bh_idx, m_top, :].set(ctx_u[:, :u, :])
    context = context.reshape(B, H, L_Q, D).astype(out_dtype)

    if output_attention:
        attns = jnp.full((BH, L_K, L_K), 1.0 / L_K, jnp.float32)
        attns = attns.at[bh_idx, m_top, :].set(
            attn_u[:, :u, :].astype(jnp.float32))
        return context, attns.reshape(B, H, L_K, L_K)
    return context, None


# ---------------------- pure-JAX reference (for checking) -------------------


def _reference_forward(queries, keys, values, tau=None, delta=None, *,
                       mask_flag=True, factor=5, scale=None,
                       output_attention=False, sample_key=None,
                       compute_dtype=jnp.float32):
    """Plain-XLA mirror of the PyTorch DSProbAttention.forward."""
    B, L_Q, H, D = queries.shape
    L_K = keys.shape[1]
    q = jnp.transpose(queries, (0, 2, 1, 3)).astype(jnp.float32)
    k = jnp.transpose(keys, (0, 2, 1, 3)).astype(jnp.float32)
    v = jnp.transpose(values, (0, 2, 1, 3)).astype(jnp.float32)
    qc, kc, vc = (x.astype(compute_dtype) for x in (q, k, v))
    U_part = min(factor * int(math.ceil(math.log(L_K))), L_K)
    u = min(factor * int(math.ceil(math.log(L_Q))), L_Q)
    if sample_key is None:
        sample_key = jax.random.PRNGKey(0)
    index_sample = jax.random.randint(sample_key, (L_Q, U_part), 0, L_K)
    k_sample = kc[:, :, index_sample, :]                        # (B,H,L_Q,U,D)
    qk_sample = jnp.einsum('bhqd,bhqsd->bhqs', qc, k_sample,
                           preferred_element_type=jnp.float32)
    M = qk_sample.max(-1) - qk_sample.sum(-1) / L_K
    m_top = lax.top_k(M, u)[1]
    q_reduce = jnp.take_along_axis(qc, m_top[..., None], axis=2)
    scores = jnp.einsum('bhud,bhkd->bhuk', q_reduce, kc,
                        preferred_element_type=jnp.float32)
    tau_v = (1.0 if tau is None
             else jnp.asarray(tau, jnp.float32).reshape(B, 1, 1, 1))
    delta_v = (0.0 if delta is None
               else jnp.asarray(delta, jnp.float32).reshape(B, 1, 1, 1))
    scores = (scores * tau_v + delta_v) * (float(scale) if scale
                                           else 1.0 / math.sqrt(D))
    if mask_flag:
        col = jnp.arange(L_K)[None, None, None, :]
        scores = jnp.where(col > m_top[..., None], -jnp.inf, scores)
        context = jnp.cumsum(v, axis=2)
    else:
        context = jnp.broadcast_to(v.mean(axis=2, keepdims=True),
                                   (B, H, L_Q, D))
    attn = jax.nn.softmax(scores, axis=-1)
    upd = jnp.einsum('bhuk,bhkd->bhud', attn.astype(compute_dtype), vc,
                     preferred_element_type=jnp.float32)
    b_idx = jnp.arange(B)[:, None, None]
    h_idx = jnp.arange(H)[None, :, None]
    context = context.at[b_idx, h_idx, m_top, :].set(upd)
    if output_attention:
        attns = jnp.full((B, H, L_K, L_K), 1.0 / L_K, jnp.float32)
        attns = attns.at[b_idx, h_idx, m_top, :].set(attn)
        return context, attns
    return context, None


# ---------------------------------- demo -----------------------------------


if __name__ == "__main__":
    root = jax.random.PRNGKey(0)
    kq, kk, kv, ks, kt, kd, kb = jax.random.split(root, 7)

    # 1) small self-attention, causal path (mask_flag=True), context only.
    B, L, H, D = 2, 8, 4, 16
    queries = jax.random.normal(kq, (B, L, H, D), dtype=jnp.float32)
    keys = jax.random.normal(kk, (B, L, H, D), dtype=jnp.float32)
    values = jax.random.normal(kv, (B, L, H, D), dtype=jnp.float32)

    ctx, attn = ds_prob_attention(
        queries, keys, values, attn_mask=None, tau=None, delta=None,
        mask_flag=True, factor=5, scale=None, output_attention=False,
        sample_key=ks)
    ctx = jax.block_until_ready(ctx)
    assert ctx.shape == (B, H, L, D) and attn is None
    assert bool(jnp.all(jnp.isfinite(ctx)))
    ctx_ref, _ = _reference_forward(
        queries, keys, values, mask_flag=True, factor=5, scale=None,
        output_attention=False, sample_key=ks, compute_dtype=jnp.bfloat16)
    err = float(jnp.max(jnp.abs(ctx - ctx_ref)))
    assert err < 0.08, f"context mismatch vs reference: {err}"

    # 2) small non-causal path with tau/delta and the attention matrix.
    tau = jax.random.uniform(kt, (B, 1), minval=0.5, maxval=1.5,
                             dtype=jnp.float32)
    delta = 0.1 * jax.random.normal(kd, (B, 1), dtype=jnp.float32)
    ctx2, attn2 = ds_prob_attention(
        queries, keys, values, attn_mask=None, tau=tau, delta=delta,
        mask_flag=False, factor=5, scale=None, output_attention=True,
        sample_key=ks)
    ctx2, attn2 = jax.block_until_ready((ctx2, attn2))
    assert ctx2.shape == (B, H, L, D) and attn2.shape == (B, H, L, L)
    assert bool(jnp.all(jnp.isfinite(ctx2)))
    assert bool(jnp.all(jnp.isfinite(attn2)))
    ctx2_ref, attn2_ref = _reference_forward(
        queries, keys, values, tau, delta, mask_flag=False, factor=5,
        scale=None, output_attention=True, sample_key=ks,
        compute_dtype=jnp.bfloat16)
    err2 = float(jnp.max(jnp.abs(ctx2 - ctx2_ref)))
    err3 = float(jnp.max(jnp.abs(attn2 - attn2_ref)))
    assert err2 < 0.08 and err3 < 0.08, (err2, err3)

    # 3) larger self-attention: exercises the chunked kernel-1 path (L_K=512,
    #    2 chunks), tq>=512 and the G>1 batched kernel-2 path.  factor is
    #    chosen so u == L_Q, making the comparison independent of top-k order.
    B3, L3, H3, D3 = 1, 512, 2, 32
    q3 = jax.random.normal(jax.random.fold_in(kb, 0), (B3, L3, H3, D3),
                           dtype=jnp.float32)
    k3 = jax.random.normal(jax.random.fold_in(kb, 1), (B3, L3, H3, D3),
                           dtype=jnp.float32)
    v3 = jax.random.normal(jax.random.fold_in(kb, 2), (B3, L3, H3, D3),
                           dtype=jnp.float32)
    ks3 = jax.random.fold_in(kb, 3)
    factor3 = 100                                     # => u = U_part = L3
    ctx3, _ = ds_prob_attention(
        q3, k3, v3, attn_mask=None, mask_flag=True, factor=factor3,
        scale=None, output_attention=False, sample_key=ks3)
    ctx3 = jax.block_until_ready(ctx3)
    assert ctx3.shape == (B3, H3, L3, D3)
    assert bool(jnp.all(jnp.isfinite(ctx3)))
    ctx3_ref, _ = _reference_forward(
        q3, k3, v3, mask_flag=True, factor=factor3, scale=None,
        output_attention=False, sample_key=ks3, compute_dtype=jnp.bfloat16)
    err4 = float(jnp.max(jnp.abs(ctx3 - ctx3_ref)))
    assert err4 < 0.1, f"large-shape context mismatch: {err4}"

    # direct numerical check of the chunked / MXU-offloaded sparsity kernel.
    BH3 = B3 * H3
    qf = jnp.transpose(q3, (0, 2, 1, 3)).reshape(BH3, L3, D3)
    kf = jnp.transpose(k3, (0, 2, 1, 3)).reshape(BH3, L3, D3)
    U3 = min(factor3 * int(math.ceil(math.log(L3))), L3)
    idx_s3 = jax.random.randint(ks3, (L3, U3), 0, L3)
    cnt3 = (jnp.zeros((L3, L3), jnp.float32)
            .at[jnp.arange(L3)[:, None], idx_s3].add(1.0)
            .astype(jnp.bfloat16))
    M3 = _sparsity_measure(qf.astype(jnp.bfloat16), kf.astype(jnp.bfloat16),
                           cnt3, vmem_limit=_vmem_limit_bytes())
    M3 = jax.block_until_ready(M3)
    qk3 = jnp.einsum('bqd,bkd->bqk',
                     qf.astype(jnp.bfloat16).astype(jnp.float32),
                     kf.astype(jnp.bfloat16).astype(jnp.float32),
                     preferred_element_type=jnp.float32)
    cnt3_f = cnt3.astype(jnp.float32)[None]
    M3_ref = (jnp.where(cnt3_f > 0, qk3, -jnp.inf).max(-1)
              - (qk3 * cnt3_f).sum(-1) / L3)
    err5 = float(jnp.max(jnp.abs(M3 - M3_ref)))
    assert err5 < 0.05, f"sparsity-measure mismatch: {err5}"

    print("KERNEL_OK")
</pallas_src>

<mosaic_0001>
module attributes {stable_mosaic.version = 11 : i64} {
  func.func @_sparsity_kernel(%arg0: i32, %arg1: i32, %arg2: memref<1x8x16xbf16, #tpu.memory_space<vmem>>, %arg3: memref<1x8x16xbf16, #tpu.memory_space<vmem>>, %arg4: memref<8x8xbf16, #tpu.memory_space<vmem>>, %arg5: memref<1x8x1xf32, #tpu.memory_space<vmem>>) attributes {dimension_semantics = [#tpu.dimension_semantics<parallel>, #tpu.dimension_semantics<parallel>], iteration_bounds = array<i64: 1, 8>, scalar_prefetch = 0 : i64, scratch_operands = 0 : i64, tpu.core_type = #tpu.core_type<tc>, window_params = [{transform_indices = @transform_0, window_bounds = array<i64: 1, 8, 16>}, {transform_indices = @transform_1, window_bounds = array<i64: 1, 8, 16>}, {pipeline_mode = #tpu.pipeline_mode<synchronous>, transform_indices = @transform_2, window_bounds = array<i64: 8, 8>}, {transform_indices = @transform_3, window_bounds = array<i64: 1, 8, 1>}]} {
    %c0 = arith.constant 0 : index
    %c0_0 = arith.constant 0 : index
    %c0_1 = arith.constant 0 : index
    %0 = vector.load %arg2[%c0, %c0_0, %c0_1] : memref<1x8x16xbf16, #tpu.memory_space<vmem>>, vector<1x8x16xbf16>
    %1 = vector.shape_cast %0 : vector<1x8x16xbf16> to vector<8x16xbf16>
    %c0_2 = arith.constant 0 : index
    %c0_3 = arith.constant 0 : index
    %c0_4 = arith.constant 0 : index
    %2 = vector.load %arg3[%c0_2, %c0_3, %c0_4] : memref<1x8x16xbf16, #tpu.memory_space<vmem>>, vector<1x8x16xbf16>
    %3 = vector.shape_cast %2 : vector<1x8x16xbf16> to vector<8x16xbf16>
    %c0_5 = arith.constant 0 : index
    %c0_6 = arith.constant 0 : index
    %4 = vector.load %arg4[%c0_5, %c0_6] : memref<8x8xbf16, #tpu.memory_space<vmem>>, vector<8x8xbf16>
    %cst = arith.constant dense<0.000000e+00> : vector<8x8xf32>
    %5 = tpu.matmul %1, %3, %cst {dimension_numbers = #tpu.dot_dimension_numbers<[1], [1], [0], [0], [0, 0, 1, 0], [], []>} : vector<8x16xbf16>, vector<8x16xbf16>, vector<8x8xf32> -> vector<8x8xf32>
    %cst_7 = arith.constant 0.000000e+00 : bf16
    %6 = vector.broadcast %cst_7 : bf16 to vector<8x8xbf16>
    %7 = arith.cmpf ogt, %4, %6 : vector<8x8xbf16>
    %cst_8 = arith.constant -1.000000e+30 : f32
    %8 = vector.broadcast %cst_8 : f32 to vector<8x8xf32>
    %9 = arith.select %7, %5, %8 : vector<8x8xi1>, vector<8x8xf32>
    %cst_9 = arith.constant dense<0xFF800000> : vector<8xf32>
    %10 = vector.multi_reduction <maximumf>, %9, %cst_9 [1] : vector<8x8xf32> to vector<8xf32>
    %11 = vector.shape_cast %10 : vector<8xf32> to vector<8x1xf32>
    %cst_10 = arith.constant dense<0.000000e+00> : vector<8x16xf32>
    %12 = tpu.matmul %4, %3, %cst_10 {dimension_numbers = #tpu.dot_dimension_numbers<[1], [0], [0], [1], [0, 0, 1, 1], [], []>} : vector<8x8xbf16>, vector<8x16xbf16>, vector<8x16xf32> -> vector<8x16xf32>
    %13 = arith.extf %1 : vector<8x16xbf16> to vector<8x16xf32>
    %14 = arith.mulf %13, %12 : vector<8x16xf32>
    %cst_11 = arith.constant dense<0.000000e+00> : vector<8xf32>
    %15 = vector.multi_reduction <add>, %14, %cst_11 [1] : vector<8x16xf32> to vector<8xf32>
    %16 = vector.shape_cast %15 : vector<8xf32> to vector<8x1xf32>
    %cst_12 = arith.constant 1.250000e-01 : f32
    %17 = vector.broadcast %cst_12 : f32 to vector<8x1xf32>
    %18 = arith.mulf %16, %17 : vector<8x1xf32>
    %19 = arith.subf %11, %18 : vector<8x1xf32>
    %c0_13 = arith.constant 0 : index
    %c0_14 = arith.constant 0 : index
    %c0_15 = arith.constant 0 : index
    %20 = vector.load %arg5[%c0_13, %c0_14, %c0_15] : memref<1x8x1xf32, #tpu.memory_space<vmem>>, vector<1x8x1xf32>
    %21 = vector.shape_cast %20 : vector<1x8x1xf32> to vector<8x1xf32>
    %22 = vector.shape_cast %19 : vector<8x1xf32> to vector<1x8x1xf32>
    tpu.vector_store %arg5[%c0_13, %c0_14, %c0_15], %22 {strides = array<i32>} : memref<1x8x1xf32, #tpu.memory_space<vmem>>, vector<1x8x1xf32>,
    return
  }
  func.func @transform_0(%arg0: i32, %arg1: i32) -> (i32, i32, i32) {
    %c0_i32 = arith.constant 0 : i32
    %c0_i32_0 = arith.constant 0 : i32
    return %arg1, %arg0, %c0_i32 : i32, i32, i32
  }
  func.func @transform_1(%arg0: i32, %arg1: i32) -> (i32, i32, i32) {
    %c0_i32 = arith.constant 0 : i32
    %c0_i32_0 = arith.constant 0 : i32
    %c0_i32_1 = arith.constant 0 : i32
    return %arg1, %c0_i32, %c0_i32_0 : i32, i32, i32
  }
  func.func @transform_2(%arg0: i32, %arg1: i32) -> (i32, i32) {
    %c0_i32 = arith.constant 0 : i32
    %c0_i32_0 = arith.constant 0 : i32
    return %arg0, %c0_i32 : i32, i32
  }
  func.func @transform_3(%arg0: i32, %arg1: i32) -> (i32, i32, i32) {
    %c0_i32 = arith.constant 0 : i32
    %c0_i32_0 = arith.constant 0 : i32
    return %arg1, %arg0, %c0_i32 : i32, i32, i32
  }
}

module attributes {stable_mosaic.version = 11 : i64} {
  func.func @_sparsity_kernel(%arg0: i32, %arg1: i32, %arg2: memref<1x8x16xbf16, #tpu.memory_space<vmem>>, %arg3: memref<1x8x16xbf16, #tpu.memory_space<vmem>>, %arg4: memref<8x8xbf16, #tpu.memory_space<vmem>>, %arg5: memref<1x8x1xf32, #tpu.memory_space<vmem>>) attributes {dimension_semantics = [#tpu.dimension_semantics<parallel>, #tpu.dimension_semantics<parallel>], iteration_bounds = array<i64: 1, 8>, scalar_prefetch = 0 : i64, scratch_operands = 0 : i64, tpu.core_type = #tpu.core_type<tc>, window_params = [{transform_indices = @transform_0, window_bounds = array<i64: 1, 8, 16>}, {transform_indices = @transform_1, window_bounds = array<i64: 1, 8, 16>}, {transform_indices = @transform_2, window_bounds = array<i64: 8, 8>}, {transform_indices = @transform_3, window_bounds = array<i64: 1, 8, 1>}]} {
    %c0 = arith.constant 0 : index
    %c0_0 = arith.constant 0 : index
    %c0_1 = arith.constant 0 : index
    %0 = vector.load %arg2[%c0, %c0_0, %c0_1] : memref<1x8x16xbf16, #tpu.memory_space<vmem>>, vector<1x8x16xbf16>
    %1 = vector.shape_cast %0 : vector<1x8x16xbf16> to vector<8x16xbf16>
    %c0_2 = arith.constant 0 : index
    %c0_3 = arith.constant 0 : index
    %c0_4 = arith.constant 0 : index
    %2 = vector.load %arg3[%c0_2, %c0_3, %c0_4] : memref<1x8x16xbf16, #tpu.memory_space<vmem>>, vector<1x8x16xbf16>
    %3 = vector.shape_cast %2 : vector<1x8x16xbf16> to vector<8x16xbf16>
    %c0_5 = arith.constant 0 : index
    %c0_6 = arith.constant 0 : index
    %4 = vector.load %arg4[%c0_5, %c0_6] : memref<8x8xbf16, #tpu.memory_space<vmem>>, vector<8x8xbf16>
    %cst = arith.constant dense<0.000000e+00> : vector<8x8xf32>
    %5 = tpu.matmul %1, %3, %cst {dimension_numbers = #tpu.dot_dimension_numbers<[1], [1], [0], [0], [0, 0, 1, 0], [], []>} : vector<8x16xbf16>, vector<8x16xbf16>, vector<8x8xf32> -> vector<8x8xf32>
    %cst_7 = arith.constant 0.000000e+00 : bf16
    %6 = vector.broadcast %cst_7 : bf16 to vector<8x8xbf16>
    %7 = arith.cmpf ogt, %4, %6 : vector<8x8xbf16>
    %cst_8 = arith.constant -1.000000e+30 : f32
    %8 = vector.broadcast %cst_8 : f32 to vector<8x8xf32>
    %9 = arith.select %7, %5, %8 : vector<8x8xi1>, vector<8x8xf32>
    %cst_9 = arith.constant dense<0xFF800000> : vector<8xf32>
    %10 = vector.multi_reduction <maximumf>, %9, %cst_9 [1] : vector<8x8xf32> to vector<8xf32>
    %11 = vector.shape_cast %10 : vector<8xf32> to vector<8x1xf32>
    %cst_10 = arith.constant dense<0.000000e+00> : vector<8x16xf32>
    %12 = tpu.matmul %4, %3, %cst_10 {dimension_numbers = #tpu.dot_dimension_numbers<[1], [0], [0], [1], [0, 0, 1, 1], [], []>} : vector<8x8xbf16>, vector<8x16xbf16>, vector<8x16xf32> -> vector<8x16xf32>
    %13 = arith.extf %1 : vector<8x16xbf16> to vector<8x16xf32>
    %14 = arith.mulf %13, %12 : vector<8x16xf32>
    %cst_11 = arith.constant dense<0.000000e+00> : vector<8xf32>
    %15 = vector.multi_reduction <add>, %14, %cst_11 [1] : vector<8x16xf32> to vector<8xf32>
    %16 = vector.shape_cast %15 : vector<8xf32> to vector<8x1xf32>
    %cst_12 = arith.constant 1.250000e-01 : f32
    %17 = vector.broadcast %cst_12 : f32 to vector<8x1xf32>
    %18 = arith.mulf %16, %17 : vector<8x1xf32>
    %19 = arith.subf %11, %18 : vector<8x1xf32>
    %c0_13 = arith.constant 0 : index
    %c0_14 = arith.constant 0 : index
    %c0_15 = arith.constant 0 : index
    %20 = vector.load %arg5[%c0_13, %c0_14, %c0_15] : memref<1x8x1xf32, #tpu.memory_space<vmem>>, vector<1x8x1xf32>
    %21 = vector.shape_cast %20 : vector<1x8x1xf32> to vector<8x1xf32>
    %22 = vector.shape_cast %19 : vector<8x1xf32> to vector<1x8x1xf32>
    tpu.vector_store %arg5[%c0_13, %c0_14, %c0_15], %22 {strides = array<i32>} : memref<1x8x1xf32, #tpu.memory_space<vmem>>, vector<1x8x1xf32>,
    return
  }
  func.func @transform_0(%arg0: i32, %arg1: i32) -> (i32, i32, i32) {
    %c0_i32 = arith.constant 0 : i32
    %c0_i32_0 = arith.constant 0 : i32
    return %arg1, %arg0, %c0_i32 : i32, i32, i32
  }
  func.func @transform_1(%arg0: i32, %arg1: i32) -> (i32, i32, i32) {
    %c0_i32 = arith.constant 0 : i32
    %c0_i32_0 = arith.constant 0 : i32
    %c0_i32_1 = arith.constant 0 : i32
    return %arg1, %c0_i32, %c0_i32_0 : i32, i32, i32
  }
  func.func @transform_2(%arg0: i32, %arg1: i32) -> (i32, i32) {
    %c0_i32 = arith.constant 0 : i32
    %c0_i32_0 = arith.constant 0 : i32
    return %arg0, %c0_i32 : i32, i32
  }
  func.func @transform_3(%arg0: i32, %arg1: i32) -> (i32, i32, i32) {
    %c0_i32 = arith.constant 0 : i32
    %c0_i32_0 = arith.constant 0 : i32
    return %arg1, %arg0, %c0_i32 : i32, i32, i32
  }
}

</mosaic_0001>

<bundles_post_ra>
// kernel: tpu_custom_call.1
= control target key start
LH: loop header
LB: loop body
LE: loop exit
PB: predicated region body
PF: predicated region fallthrough
CT: control target
= control target key end

     0   :  { %8 = vsyncpa [#allocation3], 0  ;;  %s919_s0 = inlined_call_operand.hbm [shape: bf16[8,8,16], index: 0, kind: input, shape index: {}]   ;;  %s920_s1 = inlined_call_operand.hbm [shape: bf16[8,8,16], index: 1, kind: input, shape index: {}]   ;;  %s921_s2 = inlined_call_operand.vmem [shape: bf16[8,8], index: 2, kind: input, shape index: {}]   ;;  %s922_s3 = inlined_call_operand.vmem [shape: f32[8,8,1], index: 3, kind: output, shape index: {}]  }
   0x1   :  { %10 = vsyncpa [#allocation3 + $0x1], 0 }
   0x2   :  { %11 = vsyncpa [#allocation5], 0 }
   0x3   :  { %13 = vsyncpa [#allocation5 + $0x1], 0  ;;  %s739_s12 = smov 0   ;;  %s741_s13 = smov 0  }
   0x4   :  { %s743_s14 = smov 0   ;;  %s745_s15 = smov 0  }
   0x5   :  { %s747_s16 = smov 0   ;;  %s749_s17 = smov 0  }
   0x6 LB: > { %s502_s18 = sadd.s32 4294967295, %s712_s17   ;;  %s28_s19 = sadd.s32 1, %s708_s16  ;;  %s712_s17 = sphi %s749_s17, %s19_s17   ;;  %s708_s16 = sphi %s747_s16, %s936_s16   ;;  %s704_s15 = sphi %s745_s15, %s935_s15   ;;  %s700_s14 = sphi %s743_s14, %s934_s14   ;;  %s696_s13 = sphi %s741_s13, %s933_s13   ;;  %s692_s12 = sphi %s739_s12, %s932_s12  }
   0x7   : > { %p29_p0 = scmp.ge.s32.totalorder %s28_s19, 8  ;;  %s40_s20 = sadd.s32 1, %s700_s14 }
   0x8   : > { %p47_p1 = scmp.ne.s32.totalorder %s700_s14, %s696_s13  ;;  %p48_p2 = scmp.eq.s32.totalorder %s712_s17, 0 }
   0x9   : > { %s938_s19 = smov (%p29_p0, %s28_s19), 0  ;;  %p53_p4 = scmp.ne.s32.totalorder %s696_s13, %s692_s12 }
   0xa   : > { %p775_p3 = por %p48_p2, %p47_p1  ;;  %s35_s22 = ssub.s32 %s708_s16, %s938_s19 }
   0xb   : > { %p54_p5 = scmp.eq.s32.totalorder %s502_s18, 0  ;;  %p38_p6 = scmp.eq.s32.totalorder %s35_s22, 0 }
   0xc   : > { %p546_p8 = scmp.lt.s32.totalorder %s712_s17, 8  ;;  %s791_s25 = sand.u32 1, %s700_s14  }
   0xd   : > { %p782_p7 = por %p54_p5, %p53_p4  ;;  %s508_s26 = sshll.u32 %s708_s16, 6 }
   0xe   : > { %s788_s24 = scalar_select %p38_p6, %s700_s14, %s40_s20  }
   0xf   : > { %s925_s23 = scalar_select %p782_p7, 1, 0 }
  0x10   : > { %s507_s27 = sshll.u32 %s791_s25, 2  ;;  %s800_s30 = scalar_lea.hbm %s919_s0, %s508_s26 }
  0x11   : > { %s168_s4 = scalar_lea.vmem [#allocation2], %s507_s27  ;;  %p806_p9 = pnand %p546_p8, %p775_p3 }
  0x12   : > { %s176_s5 = sshll.u32 %s168_s4, 4  ;;  %s165_s7 = scalar_lea.sflag [#allocation3], %s791_s25  ;;  %s810_s5 = int_to_ptr.vmem [resolvable:$true] %s176_s5 }
  0x13   : > { %s598_s8 = scalar_lea.hbm %s800_s30, 64  ;;  %p600_p13 = pneg %p806_p9 }
  0x14   : > { %p599_p12 = scmp.ne.s32.totalorder %s800_s30, %s598_s8  ;;  %s603_s11 = scalar_lea.hbm %s919_s0, 512 }
  0x15   : > { %p604_p2 = scmp.lt.u32.totalorder %s800_s30, %s919_s0  ;;  %p605_p3 = scmp.lt.u32.totalorder %s603_s11, %s598_s8 }
  0x16   : > { %p601_p0 = pnand %p600_p13, %p599_p12  ;;  %p607_p5 = scmp.lt.u32.totalorder %s598_s8, %s800_s30 }
  0x17   : > { %p606_p4 = por %p605_p3, %p604_p2 }
  0x18   : > { %p602_p1 = pneg %p601_p0 }
  0x19   : > { %p608_p6 = por %p607_p5, %p606_p4 }
  0x1b   : > { %p609_p8 = pnand %p608_p6, %p602_p1 }
  0x1d   : > { %612 = shalt.err (!%p609_p8)
}
  0x1e   : > { %s613_s20 = scalar_lea.vmem %s810_s5, 64  ;;  %s714_s21 = smov [#allocation2]  }
  0x1f   : > { %p614_p12 = scmp.ne.s32.totalorder %s810_s5, %s613_s20  ;;  %s618_s22 = sshll.u32 %s714_s21, 4  ;;  %s619_s22 = int_to_ptr.vmem [resolvable:$false] %s618_s22 }
  0x20   : > { %s620_s28 = scalar_lea.vmem %s619_s22, 128  ;;  %p621_p11 = scmp.lt.s32.totalorder %s810_s5, %s619_s22 }
  0x21   : > { %p616_p0 = pnand %p614_p12, %p600_p13  ;;  %p622_p2 = scmp.lt.s32.totalorder %s620_s28, %s613_s20 }
  0x23   : > { %p617_p10 = pneg %p616_p0  ;;  %p623_p3 = por %p622_p2, %p621_p11 }
  0x25   : > { %p624_p4 = pnand %p623_p3, %p617_p10 }
  0x27   : > { %627 = shalt.err (!%p624_p4)
}
  0x28   : > { %542 = dma.hbm_to_vmem [thread:$0]  (!%p806_p9), %s800_s30, 64, %s810_s5, %s165_s7  }
  0x29   : > { %p927_p1 = scmp.lt.s32.totalorder %s712_s17, 9  ;;  %p928_p5 = scmp.ge.s32.totalorder %s712_s17, 1 }
  0x2a   : > { %s853_s9 = scalar_lea.hbm %s920_s1, %s508_s26  ;;  %s187_s10 = scalar_lea.vmem [#allocation4], %s507_s27 }
  0x2b   : > { %p844_p6 = pnand %p928_p5, %p927_p1  ;;  %s194_s11 = sshll.u32 %s187_s10, 4  ;;  %s195_s11 = int_to_ptr.vmem [resolvable:$true] %s194_s11 }
  0x2c   : > { %s184_s30 = scalar_lea.sflag [#allocation5], %s791_s25  ;;  %s628_s5 = scalar_lea.hbm %s853_s9, 64 }
  0x2d   : > { %s929_s29 = scalar_select %p844_p6, 1, 0 }
  0x2e   : > { %p629_p10 = scmp.ne.s32.totalorder %s853_s9, %s628_s5  ;;  %s633_s26 = scalar_lea.hbm %s920_s1, 512 }
  0x2f   : > { %p634_p12 = scmp.lt.u32.totalorder %s853_s9, %s920_s1  ;;  %p635_p0 = scmp.lt.u32.totalorder %s633_s26, %s628_s5 }
  0x30   : > { %p631_p11 = pnand %p629_p10, %p600_p13  ;;  %p637_p3 = scmp.lt.u32.totalorder %s628_s5, %s853_s9 }
  0x31   : > { %p636_p2 = por %p635_p0, %p634_p12 }
  0x32   : > { %p632_p8 = pneg %p631_p11 }
  0x33   : > { %p638_p4 = por %p637_p3, %p636_p2 }
  0x35   : > { %p639_p1 = pnand %p638_p4, %p632_p8 }
  0x37   : > { %642 = shalt.err (!%p639_p1)
}
  0x38   : > { %s643_s25 = scalar_lea.vmem %s195_s11, 64  ;;  %s715_s27 = smov [#allocation4]  }
  0x39   : > { %p644_p5 = scmp.ne.s32.totalorder %s195_s11, %s643_s25  ;;  %s648_s21 = sshll.u32 %s715_s27, 4  ;;  %s649_s21 = int_to_ptr.vmem [resolvable:$false] %s648_s21 }
  0x3a   : > { %s650_s22 = scalar_lea.vmem %s649_s21, 128  ;;  %p651_p7 = scmp.lt.s32.totalorder %s195_s11, %s649_s21 }
  0x3b   : > { %p646_p10 = pnand %p644_p5, %p600_p13  ;;  %p652_p6 = scmp.lt.s32.totalorder %s650_s22, %s643_s25 }
  0x3d   : > { %p647_p11 = pneg %p646_p10  ;;  %p653_p0 = por %p652_p6, %p651_p7 }
  0x3f   : > { %p654_p12 = pnand %p653_p0, %p647_p11 }
  0x41   : > { %657 = shalt.err (!%p654_p12)
}
  0x42   : > { %545 = dma.hbm_to_vmem [thread:$0]  (!%p806_p9), %s853_s9, 64, %s195_s11, %s184_s30  }
  0x43   : > { %p930_p8 = scmp.ne.s32.totalorder %s929_s29, 0 }
  0x44   : > { %s205_s28 = sand.u32 (!%p930_p8), 1, %s696_s13   ;;  %p931_p13 = scmp.ne.s32.totalorder (!%p930_p8), %s925_s23, 0 }
  0x45   : > { %203 = sbr.rel (%p930_p8) target bundleno = 449 (0x1c1), region = 32  ;;  %s512_s4 = sshll.u32 (!%p930_p8), %s205_s28, 2 }
  0x46   : > { %s206_s8 = scalar_lea.sflag (!%p930_p8), [#allocation3], %s205_s28  ;;  %s209_s10 = scalar_lea.vmem (!%p930_p8), [#allocation2], %s512_s4 }
  0x4c   : > { %683 = dma.done.wait (%p931_p13), %s206_s8, 64  }
  0x4d   : > { %685 = vsyncadd (%p931_p13), %s206_s8, 4294967232  ;;  %s215_s5 = scalar_lea.sflag [#allocation5], %s205_s28  ;;  %s218_s7 = scalar_lea.vmem [#allocation4], %s512_s4 }
  0x4e   : > { %687 = dma.done.wait (%p931_p13), %s215_s5, 64  }
  0x4f   : > { %689 = vsyncadd (%p931_p13), %s215_s5, 4294967232  ;;  %v716_v0 = vmov 0.0   ;;  %vm717_vm0 = vmmov 0   ;;  %vm269_vm1 = vcmask 130048   ;;  %vm328_vm2 = vcmask 1043456   ;;  %p256_p7 = scmp.lt.s32.totalorder %s704_s15, 7 }
  0x50   : > { %523 = vmatprep.subr.bf16.mxu0 %v716_v0  ;;  %529 = vmatprep.subr.bf16.mxu1 %v716_v0  ;;  %v267_v1 = vld [vmem:[%s218_s7] sm:$0xf]  ;;  %v268_v4 = vld [vmem:[%s921_s2] sm:$0xf]  ;;  %vm321_vm3 = vcmask 64512   ;;  %v718_v6 = vmov 0  }
  0x51   : > { %531 = vmatprep.mubr.msk.bf16.mxu1 %vm717_vm0, %v716_v0  ;;  %525 = vmatprep.mubr.msk.bf16.mxu0 %vm717_vm0, %v716_v0  ;;  %v274_v2 = vsel %vm269_vm1, %v267_v1, 0  ;;  %v329_v3 = vsel %vm328_vm2, %v267_v1, 0  ;;  %v266_v5 = vld [vmem:[%s209_s10] sm:$0xf]  ;;  %vm316_vm4 = vcmp.gt.bf16.partialorder %v268_v4, 0  ;;  %s940_s15 = smov (!%p256_p7, %s704_s15), 7 }
  0x52   : > { %524 = vmatpush3.bf16.xpose.msra.mxu0 %v274_v2  ;;  %530 = vmatpush3.bf16.msra.mxu1 %v329_v3  ;;  %v317_v7 = vsel %vm316_vm4, 65537, %v718_v6  ;;  %v371_v8 = vunpack.c.l.bf16 %v266_v5  ;;  %s514_s23 = sshll.u32 %s940_s15, 3  ;;  %vm378_vm6 = vcmask 7168  }
  0x53   : > { %v318_v9 = vunpack.c.l.b16 %v317_v7  ;;  %s262_s30 = scalar_lea.vmem %s922_s3, %s514_s23 }
  0x55   : > { %532 = vmatmul.mubr.msk.bf16.vlgmr.msra.gmra.mrb[0].mxu1 %vm321_vm3, %v268_v4  ;;  %vm319_vm5 = vcmp.ne.s32.totalorder %v318_v9, 0 }
  0x59   : > { %526 = vmatmul.mubr.msk.bf16.vlgmr.msra.gmra.mrb[0].mxu0 %vm269_vm1, %v266_v5 }
 0x128   : > { %v365_v10 = vpop.f32.mrb[0].mxu1 }
 0x129   : > { %v372_v11 = vmul.f32 %v371_v8, %v365_v10  ;;  %v533_v12 = vpop.f32.mrb[1].mxu1 }
 0x12a   : > { %v368_v13 = vpop.f32.mrb[2].mxu1 }
 0x12b   : > { %v534_v14 = vpop.f32.mrb[3].mxu1  ;;  %v373_v15 = vsel %vm269_vm1, %v372_v11, 0.0 }
 0x12c   : > { %374 = vadd.xlane.f32.xlu0 %v373_v15  ;;  %v310_v16 = vpop.f32.mrb[0].mxu0 }
 0x12d   : > { %v320_v17 = vsel %vm319_vm5, %v310_v16, -1e+30  ;;  %v527_v18 = vpop.f32.mrb[1].mxu0 }
 0x12e   : > { %v313_v19 = vpop.f32.mrb[2].mxu0  ;;  %v322_v20 = vsel %vm321_vm3, %v320_v17, -inf }
 0x12f   : > { %v528_v21 = vpop.f32.mrb[3].mxu0 }
 0x130   : > { %323 = vmax.xlane.f32.xlu0 %v322_v20 }
 0x1b9   : > { %v375_v22 = vpop.xlane.xlu0 %374 }
 0x1ba   : > { %v376_v23 = vmul.f32 0.125, %v375_v22 }
 0x1bd   : > { %v324_v24 = vpop.xlane.xlu0 %323 }
 0x1be   : > { %v377_v25 = vsub.f32 %v324_v24, %v376_v23 }
 0x1c0   : > { %379 = vst.msk [vmem:[%s262_s30] sm:$0xff] %vm378_vm6, %v377_v25 }
 0x1c1 PF: > { %s19_s17 = sadd.s32 1, %s712_s17   ;;  %s932_s12 = smov %s696_s13 }
 0x1c2   : > { %p16_p9 = scmp.ge.s32.totalorder %s19_s17, 10   ;;  %s933_s13 = smov %s700_s14 }
 0x1c3   : > { %s934_s14 = smov %s788_s24  ;;  %s935_s15 = smov %s708_s16 }
 0x1c4   : > { %s936_s16 = smov %s938_s19  ;;  %18 = sbr.rel (!%p16_p9) target bundleno = 6 (0x6), region = 88 }
 0x1cb   :  { %405 = vsyncpa [#allocation3], 1 }
 0x1cc   :  { %407 = vsyncpa [#allocation3 + $0x1], 1 }
 0x1cd   :  { %408 = vsyncpa [#allocation5], 1 }
 0x1ce   :  { %410 = vsyncpa [#allocation5 + $0x1], 1 }

// kernel: tpu_custom_call.1
= control target key start
LH: loop header
LB: loop body
LE: loop exit
PB: predicated region body
PF: predicated region fallthrough
CT: control target
= control target key end

     0   :  { %8 = vsyncpa [#allocation3], 0  ;;  %s919_s0 = inlined_call_operand.hbm [shape: bf16[8,8,16], index: 0, kind: input, shape index: {}]   ;;  %s920_s1 = inlined_call_operand.hbm [shape: bf16[8,8,16], index: 1, kind: input, shape index: {}]   ;;  %s921_s2 = inlined_call_operand.vmem [shape: bf16[8,8], index: 2, kind: input, shape index: {}]   ;;  %s922_s3 = inlined_call_operand.vmem [shape: f32[8,8,1], index: 3, kind: output, shape index: {}]  }
   0x1   :  { %10 = vsyncpa [#allocation3 + $0x1], 0 }
   0x2   :  { %11 = vsyncpa [#allocation5], 0 }
   0x3   :  { %13 = vsyncpa [#allocation5 + $0x1], 0  ;;  %s739_s12 = smov 0   ;;  %s741_s13 = smov 0  }
   0x4   :  { %s743_s14 = smov 0   ;;  %s745_s15 = smov 0  }
   0x5   :  { %s747_s16 = smov 0   ;;  %s749_s17 = smov 0  }
   0x6 LB: > { %s502_s18 = sadd.s32 4294967295, %s712_s17   ;;  %s28_s19 = sadd.s32 1, %s708_s16  ;;  %s712_s17 = sphi %s749_s17, %s19_s17   ;;  %s708_s16 = sphi %s747_s16, %s936_s16   ;;  %s704_s15 = sphi %s745_s15, %s935_s15   ;;  %s700_s14 = sphi %s743_s14, %s934_s14   ;;  %s696_s13 = sphi %s741_s13, %s933_s13   ;;  %s692_s12 = sphi %s739_s12, %s932_s12  }
   0x7   : > { %p29_p0 = scmp.ge.s32.totalorder %s28_s19, 8  ;;  %s40_s20 = sadd.s32 1, %s700_s14 }
   0x8   : > { %p47_p1 = scmp.ne.s32.totalorder %s700_s14, %s696_s13  ;;  %p48_p2 = scmp.eq.s32.totalorder %s712_s17, 0 }
   0x9   : > { %s938_s19 = smov (%p29_p0, %s28_s19), 0  ;;  %p53_p4 = scmp.ne.s32.totalorder %s696_s13, %s692_s12 }
   0xa   : > { %p775_p3 = por %p48_p2, %p47_p1  ;;  %s35_s22 = ssub.s32 %s708_s16, %s938_s19 }
   0xb   : > { %p54_p5 = scmp.eq.s32.totalorder %s502_s18, 0  ;;  %p38_p6 = scmp.eq.s32.totalorder %s35_s22, 0 }
   0xc   : > { %p546_p8 = scmp.lt.s32.totalorder %s712_s17, 8  ;;  %s791_s25 = sand.u32 1, %s700_s14  }
   0xd   : > { %p782_p7 = por %p54_p5, %p53_p4  ;;  %s508_s26 = sshll.u32 %s708_s16, 6 }
   0xe   : > { %s788_s24 = scalar_select %p38_p6, %s700_s14, %s40_s20  }
   0xf   : > { %s925_s23 = scalar_select %p782_p7, 1, 0 }
  0x10   : > { %s507_s27 = sshll.u32 %s791_s25, 2  ;;  %s800_s30 = scalar_lea.hbm %s919_s0, %s508_s26 }
  0x11   : > { %s168_s4 = scalar_lea.vmem [#allocation2], %s507_s27  ;;  %p806_p9 = pnand %p546_p8, %p775_p3 }
  0x12   : > { %s176_s5 = sshll.u32 %s168_s4, 4  ;;  %s165_s7 = scalar_lea.sflag [#allocation3], %s791_s25  ;;  %s810_s5 = int_to_ptr.vmem [resolvable:$true] %s176_s5 }
  0x13   : > { %s598_s8 = scalar_lea.hbm %s800_s30, 64  ;;  %p600_p13 = pneg %p806_p9 }
  0x14   : > { %p599_p12 = scmp.ne.s32.totalorder %s800_s30, %s598_s8  ;;  %s603_s11 = scalar_lea.hbm %s919_s0, 512 }
  0x15   : > { %p604_p2 = scmp.lt.u32.totalorder %s800_s30, %s919_s0  ;;  %p605_p3 = scmp.lt.u32.totalorder %s603_s11, %s598_s8 }
  0x16   : > { %p601_p0 = pnand %p600_p13, %p599_p12  ;;  %p607_p5 = scmp.lt.u32.totalorder %s598_s8, %s800_s30 }
  0x17   : > { %p606_p4 = por %p605_p3, %p604_p2 }
  0x18   : > { %p602_p1 = pneg %p601_p0 }
  0x19   : > { %p608_p6 = por %p607_p5, %p606_p4 }
  0x1b   : > { %p609_p8 = pnand %p608_p6, %p602_p1 }
  0x1d   : > { %612 = shalt.err (!%p609_p8)
}
  0x1e   : > { %s613_s20 = scalar_lea.vmem %s810_s5, 64  ;;  %s714_s21 = smov [#allocation2]  }
  0x1f   : > { %p614_p12 = scmp.ne.s32.totalorder %s810_s5, %s613_s20  ;;  %s618_s22 = sshll.u32 %s714_s21, 4  ;;  %s619_s22 = int_to_ptr.vmem [resolvable:$false] %s618_s22 }
  0x20   : > { %s620_s28 = scalar_lea.vmem %s619_s22, 128  ;;  %p621_p11 = scmp.lt.s32.totalorder %s810_s5, %s619_s22 }
  0x21   : > { %p616_p0 = pnand %p614_p12, %p600_p13  ;;  %p622_p2 = scmp.lt.s32.totalorder %s620_s28, %s613_s20 }
  0x23   : > { %p617_p10 = pneg %p616_p0  ;;  %p623_p3 = por %p622_p2, %p621_p11 }
  0x25   : > { %p624_p4 = pnand %p623_p3, %p617_p10 }
  0x27   : > { %627 = shalt.err (!%p624_p4)
}
  0x28   : > { %542 = dma.hbm_to_vmem [thread:$0]  (!%p806_p9), %s800_s30, 64, %s810_s5, %s165_s7  }
  0x29   : > { %p927_p1 = scmp.lt.s32.totalorder %s712_s17, 9  ;;  %p928_p5 = scmp.ge.s32.totalorder %s712_s17, 1 }
  0x2a   : > { %s853_s9 = scalar_lea.hbm %s920_s1, %s508_s26  ;;  %s187_s10 = scalar_lea.vmem [#allocation4], %s507_s27 }
  0x2b   : > { %p844_p6 = pnand %p928_p5, %p927_p1  ;;  %s194_s11 = sshll.u32 %s187_s10, 4  ;;  %s195_s11 = int_to_ptr.vmem [resolvable:$true] %s194_s11 }
  0x2c   : > { %s184_s30 = scalar_lea.sflag [#allocation5], %s791_s25  ;;  %s628_s5 = scalar_lea.hbm %s853_s9, 64 }
  0x2d   : > { %s929_s29 = scalar_select %p844_p6, 1, 0 }
  0x2e   : > { %p629_p10 = scmp.ne.s32.totalorder %s853_s9, %s628_s5  ;;  %s633_s26 = scalar_lea.hbm %s920_s1, 512 }
  0x2f   : > { %p634_p12 = scmp.lt.u32.totalorder %s853_s9, %s920_s1  ;;  %p635_p0 = scmp.lt.u32.totalorder %s633_s26, %s628_s5 }
  0x30   : > { %p631_p11 = pnand %p629_p10, %p600_p13  ;;  %p637_p3 = scmp.lt.u32.totalorder %s628_s5, %s853_s9 }
  0x31   : > { %p636_p2 = por %p635_p0, %p634_p12 }
  0x32   : > { %p632_p8 = pneg %p631_p11 }
  0x33   : > { %p638_p4 = por %p637_p3, %p636_p2 }
  0x35   : > { %p639_p1 = pnand %p638_p4, %p632_p8 }
  0x37   : > { %642 = shalt.err (!%p639_p1)
}
  0x38   : > { %s643_s25 = scalar_lea.vmem %s195_s11, 64  ;;  %s715_s27 = smov [#allocation4]  }
  0x39   : > { %p644_p5 = scmp.ne.s32.totalorder %s195_s11, %s643_s25  ;;  %s648_s21 = sshll.u32 %s715_s27, 4  ;;  %s649_s21 = int_to_ptr.vmem [resolvable:$false] %s648_s21 }
  0x3a   : > { %s650_s22 = scalar_lea.vmem %s649_s21, 128  ;;  %p651_p7 = scmp.lt.s32.totalorder %s195_s11, %s649_s21 }
  0x3b   : > { %p646_p10 = pnand %p644_p5, %p600_p13  ;;  %p652_p6 = scmp.lt.s32.totalorder %s650_s22, %s643_s25 }
  0x3d   : > { %p647_p11 = pneg %p646_p10  ;;  %p653_p0 = por %p652_p6, %p651_p7 }
  0x3f   : > { %p654_p12 = pnand %p653_p0, %p647_p11 }
  0x41   : > { %657 = shalt.err (!%p654_p12)
}
  0x42   : > { %545 = dma.hbm_to_vmem [thread:$0]  (!%p806_p9), %s853_s9, 64, %s195_s11, %s184_s30  }
  0x43   : > { %p930_p8 = scmp.ne.s32.totalorder %s929_s29, 0 }
  0x44   : > { %s205_s28 = sand.u32 (!%p930_p8), 1, %s696_s13   ;;  %p931_p13 = scmp.ne.s32.totalorder (!%p930_p8), %s925_s23, 0 }
  0x45   : > { %203 = sbr.rel (%p930_p8) target bundleno = 449 (0x1c1), region = 32  ;;  %s512_s4 = sshll.u32 (!%p930_p8), %s205_s28, 2 }
  0x46   : > { %s206_s8 = scalar_lea.sflag (!%p930_p8), [#allocation3], %s205_s28  ;;  %s209_s10 = scalar_lea.vmem (!%p930_p8), [#allocation2], %s512_s4 }
  0x4c   : > { %683 = dma.done.wait (%p931_p13), %s206_s8, 64  }
  0x4d   : > { %685 = vsyncadd (%p931_p13), %s206_s8, 4294967232  ;;  %s215_s5 = scalar_lea.sflag [#allocation5], %s205_s28  ;;  %s218_s7 = scalar_lea.vmem [#allocation4], %s512_s4 }
  0x4e   : > { %687 = dma.done.wait (%p931_p13), %s215_s5, 64  }
  0x4f   : > { %689 = vsyncadd (%p931_p13), %s215_s5, 4294967232  ;;  %v716_v0 = vmov 0.0   ;;  %vm717_vm0 = vmmov 0   ;;  %vm269_vm1 = vcmask 130048   ;;  %vm328_vm2 = vcmask 1043456   ;;  %p256_p7 = scmp.lt.s32.totalorder %s704_s15, 7 }
  0x50   : > { %523 = vmatprep.subr.bf16.mxu0 %v716_v0  ;;  %529 = vmatprep.subr.bf16.mxu1 %v716_v0  ;;  %v267_v1 = vld [vmem:[%s218_s7] sm:$0xf]  ;;  %v268_v4 = vld [vmem:[%s921_s2] sm:$0xf]  ;;  %vm321_vm3 = vcmask 64512   ;;  %v718_v6 = vmov 0  }
  0x51   : > { %531 = vmatprep.mubr.msk.bf16.mxu1 %vm717_vm0, %v716_v0  ;;  %525 = vmatprep.mubr.msk.bf16.mxu0 %vm717_vm0, %v716_v0  ;;  %v274_v2 = vsel %vm269_vm1, %v267_v1, 0  ;;  %v329_v3 = vsel %vm328_vm2, %v267_v1, 0  ;;  %v266_v5 = vld [vmem:[%s209_s10] sm:$0xf]  ;;  %vm316_vm4 = vcmp.gt.bf16.partialorder %v268_v4, 0  ;;  %s940_s15 = smov (!%p256_p7, %s704_s15), 7 }
  0x52   : > { %524 = vmatpush3.bf16.xpose.msra.mxu0 %v274_v2  ;;  %530 = vmatpush3.bf16.msra.mxu1 %v329_v3  ;;  %v317_v7 = vsel %vm316_vm4, 65537, %v718_v6  ;;  %v371_v8 = vunpack.c.l.bf16 %v266_v5  ;;  %s514_s23 = sshll.u32 %s940_s15, 3  ;;  %vm378_vm6 = vcmask 7168  }
  0x53   : > { %v318_v9 = vunpack.c.l.b16 %v317_v7  ;;  %s262_s30 = scalar_lea.vmem %s922_s3, %s514_s23 }
  0x55   : > { %532 = vmatmul.mubr.msk.bf16.vlgmr.msra.gmra.mrb[0].mxu1 %vm321_vm3, %v268_v4  ;;  %vm319_vm5 = vcmp.ne.s32.totalorder %v318_v9, 0 }
  0x59   : > { %526 = vmatmul.mubr.msk.bf16.vlgmr.msra.gmra.mrb[0].mxu0 %vm269_vm1, %v266_v5 }
 0x128   : > { %v365_v10 = vpop.f32.mrb[0].mxu1 }
 0x129   : > { %v372_v11 = vmul.f32 %v371_v8, %v365_v10  ;;  %v533_v12 = vpop.f32.mrb[1].mxu1 }
 0x12a   : > { %v368_v13 = vpop.f32.mrb[2].mxu1 }
 0x12b   : > { %v534_v14 = vpop.f32.mrb[3].mxu1  ;;  %v373_v15 = vsel %vm269_vm1, %v372_v11, 0.0 }
 0x12c   : > { %374 = vadd.xlane.f32.xlu0 %v373_v15  ;;  %v310_v16 = vpop.f32.mrb[0].mxu0 }
 0x12d   : > { %v320_v17 = vsel %vm319_vm5, %v310_v16, -1e+30  ;;  %v527_v18 = vpop.f32.mrb[1].mxu0 }
 0x12e   : > { %v313_v19 = vpop.f32.mrb[2].mxu0  ;;  %v322_v20 = vsel %vm321_vm3, %v320_v17, -inf }
 0x12f   : > { %v528_v21 = vpop.f32.mrb[3].mxu0 }
 0x130   : > { %323 = vmax.xlane.f32.xlu0 %v322_v20 }
 0x1b9   : > { %v375_v22 = vpop.xlane.xlu0 %374 }
 0x1ba   : > { %v376_v23 = vmul.f32 0.125, %v375_v22 }
 0x1bd   : > { %v324_v24 = vpop.xlane.xlu0 %323 }
 0x1be   : > { %v377_v25 = vsub.f32 %v324_v24, %v376_v23 }
 0x1c0   : > { %379 = vst.msk [vmem:[%s262_s30] sm:$0xff] %vm378_vm6, %v377_v25 }
 0x1c1 PF: > { %s19_s17 = sadd.s32 1, %s712_s17   ;;  %s932_s12 = smov %s696_s13 }
 0x1c2   : > { %p16_p9 = scmp.ge.s32.totalorder %s19_s17, 10   ;;  %s933_s13 = smov %s700_s14 }
 0x1c3   : > { %s934_s14 = smov %s788_s24  ;;  %s935_s15 = smov %s708_s16 }
 0x1c4   : > { %s936_s16 = smov %s938_s19  ;;  %18 = sbr.rel (!%p16_p9) target bundleno = 6 (0x6), region = 88 }
 0x1cb   :  { %405 = vsyncpa [#allocation3], 1 }
 0x1cc   :  { %407 = vsyncpa [#allocation3 + $0x1], 1 }
 0x1cd   :  { %408 = vsyncpa [#allocation5], 1 }
 0x1ce   :  { %410 = vsyncpa [#allocation5 + $0x1], 1 }

</bundles_post_ra>
